<compile_context>
chip_gen: v5e
topology: v5e:2x2
jax: 0.10.0
libtpu: 0.0.40
codegen_flags: <defaults>
</compile_context>

<pallas_src>
import math
from functools import partial

import jax
import jax.numpy as jnp
from jax.experimental import pallas as pl
from jax.experimental.pallas import tpu as pltpu


# ----------------------------- fused encoder kernel -------------------------
def _encoder_kernel(x_ref, pe_ref,
                    wq_ref, wk_ref, wv_ref, wo_ref,
                    bq_ref, bk_ref, bv_ref,
                    w1_ref, b1_ref, w2_ref, vecd_ref,
                    o_ref, *, num_heads):
    """grid = (B, L).  o_ref is the VMEM-resident activation carried over L."""
    l = pl.program_id(1)

    # Layer 0: seed the resident activation with x + positional encoding.
    @pl.when(l == 0)
    def _():
        o_ref[0] = (x_ref[0] + pe_ref[0]).astype(o_ref.dtype)

    x = o_ref[0].astype(jnp.float32)          # (S, D) previous-layer output
    S, D = x.shape
    H = num_heads
    dh = D // H
    scale = 1.0 / math.sqrt(dh)
    eps = 1e-5

    wq = wq_ref[0]                            # (H, D, dh)
    wk = wk_ref[0]
    wv = wv_ref[0]
    wo = wo_ref[0]                            # (H, dh, D)
    bq = bq_ref[0]                            # (H, 1, dh)
    bk = bk_ref[0]
    bv = bv_ref[0]
    vecd = vecd_ref[0]                        # (6, D): bo, g1, be1, b2, g2, be2
    bo, g1, be1 = vecd[0:1], vecd[1:2], vecd[2:3]
    b2, g2, be2 = vecd[3:4], vecd[4:5], vecd[5:6]

    # --- multi-head self attention (heads batched on the leading axis) ---
    xh = jnp.broadcast_to(x, (H, S, D))       # tiny; keeps head axis leading
    qh = (jnp.einsum("hsd,hdk->hsk", xh, wq,
                     preferred_element_type=jnp.float32) + bq) * scale
    kh = jnp.einsum("hsd,hdk->hsk", xh, wk,
                    preferred_element_type=jnp.float32) + bk
    vh = jnp.einsum("hsd,hdk->hsk", xh, wv,
                    preferred_element_type=jnp.float32) + bv

    s = jnp.einsum("hqd,hkd->hqk", qh, kh,
                   preferred_element_type=jnp.float32)          # (H, S, S)
    s = s - jnp.max(s, axis=-1, keepdims=True)
    p = jnp.exp(s)
    p = p * pl.reciprocal(jnp.sum(p, axis=-1, keepdims=True), approx=True)
    ctx = jnp.einsum("hqk,hkd->hqd", p, vh,
                     preferred_element_type=jnp.float32)        # (H, S, dh)

    # concat(heads) @ Wo  ==  sum_h ctx_h @ Wo_h
    attn = jnp.einsum("hqd,hdn->hqn", ctx, wo,
                      preferred_element_type=jnp.float32)       # (H, S, D)
    attn = jnp.sum(attn, axis=0) + bo                           # (S, D)

    # --- residual + layer norm 1 ---
    h1 = x + attn
    mu = jnp.mean(h1, axis=-1, keepdims=True)
    var = jnp.mean(jnp.square(h1 - mu), axis=-1, keepdims=True)
    y = (h1 - mu) * jax.lax.rsqrt(var + eps) * g1 + be1

    # --- feed-forward ---
    ff = jnp.dot(y, w1_ref[0], preferred_element_type=jnp.float32) + b1_ref[0]
    ff = jnp.maximum(ff, 0.0)
    ff = jnp.dot(ff, w2_ref[0], preferred_element_type=jnp.float32) + b2

    # --- residual + layer norm 2 ---
    h2 = y + ff
    mu2 = jnp.mean(h2, axis=-1, keepdims=True)
    var2 = jnp.mean(jnp.square(h2 - mu2), axis=-1, keepdims=True)
    z = (h2 - mu2) * jax.lax.rsqrt(var2 + eps) * g2 + be2

    o_ref[0] = z.astype(o_ref.dtype)


def encoder_forward(x, pe, params, num_heads):
    B, S, D = x.shape
    L, H = params["wq"].shape[0], num_heads
    dh = D // H
    F = params["w1"].shape[-1]

    act_map = lambda b, l: (b, 0, 0)     # constant over l -> VMEM-resident carry
    pe_map = lambda b, l: (0, 0, 0)
    w3_map = lambda b, l: (l, 0, 0)
    w4_map = lambda b, l: (l, 0, 0, 0)

    in_specs = [
        pl.BlockSpec((1, S, D), act_map),          # x
        pl.BlockSpec((1, S, D), pe_map),           # pe
        pl.BlockSpec((1, H, D, dh), w4_map),       # wq  (head-split)
        pl.BlockSpec((1, H, D, dh), w4_map),       # wk
        pl.BlockSpec((1, H, D, dh), w4_map),       # wv
        pl.BlockSpec((1, H, dh, D), w4_map),       # wo
        pl.BlockSpec((1, H, 1, dh), w4_map),       # bq
        pl.BlockSpec((1, H, 1, dh), w4_map),       # bk
        pl.BlockSpec((1, H, 1, dh), w4_map),       # bv
        pl.BlockSpec((1, D, F), w3_map),           # w1
        pl.BlockSpec((1, 1, F), w3_map),           # b1
        pl.BlockSpec((1, F, D), w3_map),           # w2
        pl.BlockSpec((1, 6, D), w3_map),           # vecd = [bo,g1,be1,b2,g2,be2]
    ]

    return pl.pallas_call(
        partial(_encoder_kernel, num_heads=num_heads),
        out_shape=jax.ShapeDtypeStruct((B, S, D), x.dtype),
        grid=(B, L),
        in_specs=in_specs,
        out_specs=pl.BlockSpec((1, S, D), act_map),
        compiler_params=pltpu.CompilerParams(
            dimension_semantics=("parallel", "arbitrary")),
    )(x, pe,
      params["wq"], params["wk"], params["wv"], params["wo"],
      params["bq"], params["bk"], params["bv"],
      params["w1"], params["b1"], params["w2"], params["vecd"])


# ----------------------------- params / PE table ----------------------------
def make_positional_encoding(seq_len, d_model):
    pos = jnp.arange(seq_len, dtype=jnp.float32)[:, None]
    i = jnp.arange(0, d_model, 2, dtype=jnp.float32)[None, :]
    div = jnp.exp(-math.log(10000.0) * i / d_model)
    pe = jnp.zeros((seq_len, d_model), jnp.float32)
    pe = pe.at[:, 0::2].set(jnp.sin(pos * div))
    pe = pe.at[:, 1::2].set(jnp.cos(pos * div))
    return pe[None]  # (1, S, D)


def init_encoder_params(key, num_layers, d_model, d_ff, num_heads):
    """Weights stored [in, out] (x @ W + b). Stacked over layers and pre-split
    per head so the kernel never touches activation minor-dim layout."""
    D, F, H, L = d_model, d_ff, num_heads, num_layers
    dh = D // H
    s, sf = 1.0 / math.sqrt(D), 1.0 / math.sqrt(F)

    def layer(k):
        ks = jax.random.split(k, 16)
        return dict(
            wq=jax.random.normal(ks[0], (D, D)) * s,
            wk=jax.random.normal(ks[1], (D, D)) * s,
            wv=jax.random.normal(ks[2], (D, D)) * s,
            wo=jax.random.normal(ks[3], (D, D)) * s,
            w1=jax.random.normal(ks[4], (D, F)) * s,
            w2=jax.random.normal(ks[5], (F, D)) * sf,
            bq=jax.random.normal(ks[6], (D,)) * s,
            bk=jax.random.normal(ks[7], (D,)) * s,
            bv=jax.random.normal(ks[8], (D,)) * s,
            bo=jax.random.normal(ks[9], (D,)) * s,
            b1=jax.random.normal(ks[10], (F,)) * s,
            b2=jax.random.normal(ks[11], (D,)) * sf,
            g1=1.0 + 0.05 * jax.random.normal(ks[12], (D,)),
            be1=0.05 * jax.random.normal(ks[13], (D,)),
            g2=1.0 + 0.05 * jax.random.normal(ks[14], (D,)),
            be2=0.05 * jax.random.normal(ks[15], (D,)),
        )

    layers = [layer(jax.random.fold_in(key, l)) for l in range(L)]
    stk = lambda n: jnp.stack([lyr[n] for lyr in layers]).astype(jnp.float32)

    return {
        "wq": stk("wq").reshape(L, D, H, dh).transpose(0, 2, 1, 3),  # (L,H,D,dh)
        "wk": stk("wk").reshape(L, D, H, dh).transpose(0, 2, 1, 3),
        "wv": stk("wv").reshape(L, D, H, dh).transpose(0, 2, 1, 3),
        "wo": stk("wo").reshape(L, H, dh, D),                        # (L,H,dh,D)
        "bq": stk("bq").reshape(L, H, 1, dh),
        "bk": stk("bk").reshape(L, H, 1, dh),
        "bv": stk("bv").reshape(L, H, 1, dh),
        "w1": stk("w1"),                                             # (L,D,F)
        "b1": stk("b1").reshape(L, 1, F),
        "w2": stk("w2"),                                             # (L,F,D)
        "vecd": jnp.stack([stk("bo"), stk("g1"), stk("be1"),
                           stk("b2"), stk("g2"), stk("be2")], axis=1),  # (L,6,D)
    }


# ----------------------------- pure-JAX reference ---------------------------
def encoder_reference(x, pe, params, num_heads):
    B, S, D = x.shape
    L, H = params["wq"].shape[0], num_heads
    dh = D // H
    eps = 1e-5

    def ln(v, g, b):
        mu = jnp.mean(v, axis=-1, keepdims=True)
        var = jnp.mean((v - mu) ** 2, axis=-1, keepdims=True)
        return (v - mu) / jnp.sqrt(var + eps) * g + b

    out = x + pe
    for l in range(L):
        wq = params["wq"][l].transpose(1, 0, 2).reshape(D, D)
        wk = params["wk"][l].transpose(1, 0, 2).reshape(D, D)
        wv = params["wv"][l].transpose(1, 0, 2).reshape(D, D)
        wo = params["wo"][l].reshape(D, D)
        bq = params["bq"][l].reshape(D)
        bk = params["bk"][l].reshape(D)
        bv = params["bv"][l].reshape(D)
        bo, g1, be1, b2, g2, be2 = [params["vecd"][l, i] for i in range(6)]
        w1, w2 = params["w1"][l], params["w2"][l]
        b1 = params["b1"][l].reshape(-1)

        q = out @ wq + bq
        k = out @ wk + bk
        v = out @ wv + bv
        qh = q.reshape(B, S, H, dh).transpose(0, 2, 1, 3)
        kh = k.reshape(B, S, H, dh).transpose(0, 2, 1, 3)
        vh = v.reshape(B, S, H, dh).transpose(0, 2, 1, 3)
        s = jnp.einsum("bhqd,bhkd->bhqk", qh, kh) / math.sqrt(dh)
        p = jax.nn.softmax(s, axis=-1)
        ctx = jnp.einsum("bhqk,bhkd->bhqd", p, vh)
        attn = ctx.transpose(0, 2, 1, 3).reshape(B, S, D) @ wo + bo

        y = ln(out + attn, g1, be1)
        ff = jnp.maximum(y @ w1 + b1, 0.0) @ w2 + b2
        out = ln(y + ff, g2, be2)
    return out


# ----------------------------- main ------------------------------------------
if __name__ == "__main__":
    # Small shapes consistent with the module: num_encoders=2, num_heads=4,
    # d_model=32, d_feedforward=64, seq_len=8, batch=2.
    B, S, D, H, F, L = 2, 8, 32, 4, 64, 2
    key = jax.random.PRNGKey(0)
    kx, kp = jax.random.split(key)

    x = jax.random.normal(kx, (B, S, D), jnp.float32)
    params = init_encoder_params(kp, L, D, F, H)
    pe = make_positional_encoding(S, D)

    out = encoder_forward(x, pe, params, H)
    jax.block_until_ready(out)
    assert out.shape == (B, S, D) and out.dtype == jnp.float32

    ref = encoder_reference(x, pe, params, H)
    err = float(jnp.max(jnp.abs(out - ref)))
    assert jnp.allclose(out, ref, atol=2e-2, rtol=2e-2), err

    print("KERNEL_OK")
</pallas_src>

<mosaic_0001>
module attributes {stable_mosaic.version = 11 : i64} {
  func.func @_encoder_kernel(%arg0: i32, %arg1: i32, %arg2: memref<1x8x32xf32, #tpu.memory_space<vmem>>, %arg3: memref<1x8x32xf32, #tpu.memory_space<vmem>>, %arg4: memref<1x4x32x8xf32, #tpu.memory_space<vmem>>, %arg5: memref<1x4x32x8xf32, #tpu.memory_space<vmem>>, %arg6: memref<1x4x32x8xf32, #tpu.memory_space<vmem>>, %arg7: memref<1x4x8x32xf32, #tpu.memory_space<vmem>>, %arg8: memref<1x4x1x8xf32, #tpu.memory_space<vmem>>, %arg9: memref<1x4x1x8xf32, #tpu.memory_space<vmem>>, %arg10: memref<1x4x1x8xf32, #tpu.memory_space<vmem>>, %arg11: memref<1x32x64xf32, #tpu.memory_space<vmem>>, %arg12: memref<1x1x64xf32, #tpu.memory_space<vmem>>, %arg13: memref<1x64x32xf32, #tpu.memory_space<vmem>>, %arg14: memref<1x6x32xf32, #tpu.memory_space<vmem>>, %arg15: memref<1x8x32xf32, #tpu.memory_space<vmem>>) attributes {dimension_semantics = [#tpu.dimension_semantics<parallel>, #tpu.dimension_semantics<arbitrary>], iteration_bounds = array<i64: 2, 2>, scalar_prefetch = 0 : i64, scratch_operands = 0 : i64, tpu.core_type = #tpu.core_type<tc>, window_params = [{transform_indices = @transform_0, window_bounds = array<i64: 1, 8, 32>}, {pipeline_mode = #tpu.pipeline_mode<synchronous>, transform_indices = @transform_1, window_bounds = array<i64: 1, 8, 32>}, {transform_indices = @transform_2, window_bounds = array<i64: 1, 4, 32, 8>}, {transform_indices = @transform_3, window_bounds = array<i64: 1, 4, 32, 8>}, {transform_indices = @transform_4, window_bounds = array<i64: 1, 4, 32, 8>}, {transform_indices = @transform_5, window_bounds = array<i64: 1, 4, 8, 32>}, {transform_indices = @transform_6, window_bounds = array<i64: 1, 4, 1, 8>}, {transform_indices = @transform_7, window_bounds = array<i64: 1, 4, 1, 8>}, {transform_indices = @transform_8, window_bounds = array<i64: 1, 4, 1, 8>}, {transform_indices = @transform_9, window_bounds = array<i64: 1, 32, 64>}, {transform_indices = @transform_10, window_bounds = array<i64: 1, 1, 64>}, {transform_indices = @transform_11, window_bounds = array<i64: 1, 64, 32>}, {transform_indices = @transform_12, window_bounds = array<i64: 1, 6, 32>}, {transform_indices = @transform_13, window_bounds = array<i64: 1, 8, 32>}]} {
    %c0_i32 = arith.constant 0 : i32
    %0 = arith.cmpi eq, %arg1, %c0_i32 : i32
    %1 = arith.extui %0 : i1 to i32
    %c0_i32_0 = arith.constant 0 : i32
    %2 = arith.cmpi ne, %1, %c0_i32_0 : i32
    scf.if %2 {
      %c0_68 = arith.constant 0 : index
      %c0_69 = arith.constant 0 : index
      %c0_70 = arith.constant 0 : index
      %119 = vector.load %arg2[%c0_68, %c0_69, %c0_70] : memref<1x8x32xf32, #tpu.memory_space<vmem>>, vector<1x8x32xf32>
      %120 = vector.shape_cast %119 : vector<1x8x32xf32> to vector<8x32xf32>
      %c0_71 = arith.constant 0 : index
      %c0_72 = arith.constant 0 : index
      %c0_73 = arith.constant 0 : index
      %121 = vector.load %arg3[%c0_71, %c0_72, %c0_73] : memref<1x8x32xf32, #tpu.memory_space<vmem>>, vector<1x8x32xf32>
      %122 = vector.shape_cast %121 : vector<1x8x32xf32> to vector<8x32xf32>
      %123 = arith.addf %120, %122 : vector<8x32xf32>
      %c0_74 = arith.constant 0 : index
      %c0_75 = arith.constant 0 : index
      %c0_76 = arith.constant 0 : index
      %124 = vector.load %arg15[%c0_74, %c0_75, %c0_76] : memref<1x8x32xf32, #tpu.memory_space<vmem>>, vector<1x8x32xf32>
      %125 = vector.shape_cast %124 : vector<1x8x32xf32> to vector<8x32xf32>
      %126 = vector.shape_cast %123 : vector<8x32xf32> to vector<1x8x32xf32>
      tpu.vector_store %arg15[%c0_74, %c0_75, %c0_76], %126 {strides = array<i32>} : memref<1x8x32xf32, #tpu.memory_space<vmem>>, vector<1x8x32xf32>,
    } else {
    }
    %c0 = arith.constant 0 : index
    %c0_1 = arith.constant 0 : index
    %c0_2 = arith.constant 0 : index
    %3 = vector.load %arg15[%c0, %c0_1, %c0_2] : memref<1x8x32xf32, #tpu.memory_space<vmem>>, vector<1x8x32xf32>
    %4 = vector.shape_cast %3 : vector<1x8x32xf32> to vector<8x32xf32>
    %c0_3 = arith.constant 0 : index
    %c0_4 = arith.constant 0 : index
    %c0_5 = arith.constant 0 : index
    %c0_6 = arith.constant 0 : index
    %5 = vector.load %arg4[%c0_3, %c0_4, %c0_5, %c0_6] : memref<1x4x32x8xf32, #tpu.memory_space<vmem>>, vector<1x4x32x8xf32>
    %6 = vector.shape_cast %5 : vector<1x4x32x8xf32> to vector<4x32x8xf32>
    %c0_7 = arith.constant 0 : index
    %c0_8 = arith.constant 0 : index
    %c0_9 = arith.constant 0 : index
    %c0_10 = arith.constant 0 : index
    %7 = vector.load %arg5[%c0_7, %c0_8, %c0_9, %c0_10] : memref<1x4x32x8xf32, #tpu.memory_space<vmem>>, vector<1x4x32x8xf32>
    %8 = vector.shape_cast %7 : vector<1x4x32x8xf32> to vector<4x32x8xf32>
    %c0_11 = arith.constant 0 : index
    %c0_12 = arith.constant 0 : index
    %c0_13 = arith.constant 0 : index
    %c0_14 = arith.constant 0 : index
    %9 = vector.load %arg6[%c0_11, %c0_12, %c0_13, %c0_14] : memref<1x4x32x8xf32, #tpu.memory_space<vmem>>, vector<1x4x32x8xf32>
    %10 = vector.shape_cast %9 : vector<1x4x32x8xf32> to vector<4x32x8xf32>
    %c0_15 = arith.constant 0 : index
    %c0_16 = arith.constant 0 : index
    %c0_17 = arith.constant 0 : index
    %c0_18 = arith.constant 0 : index
    %11 = vector.load %arg7[%c0_15, %c0_16, %c0_17, %c0_18] : memref<1x4x8x32xf32, #tpu.memory_space<vmem>>, vector<1x4x8x32xf32>
    %12 = vector.shape_cast %11 : vector<1x4x8x32xf32> to vector<4x8x32xf32>
    %c0_19 = arith.constant 0 : index
    %c0_20 = arith.constant 0 : index
    %c0_21 = arith.constant 0 : index
    %c0_22 = arith.constant 0 : index
    %13 = vector.load %arg8[%c0_19, %c0_20, %c0_21, %c0_22] : memref<1x4x1x8xf32, #tpu.memory_space<vmem>>, vector<1x4x1x8xf32>
    %14 = vector.shape_cast %13 : vector<1x4x1x8xf32> to vector<4x1x8xf32>
    %c0_23 = arith.constant 0 : index
    %c0_24 = arith.constant 0 : index
    %c0_25 = arith.constant 0 : index
    %c0_26 = arith.constant 0 : index
    %15 = vector.load %arg9[%c0_23, %c0_24, %c0_25, %c0_26] : memref<1x4x1x8xf32, #tpu.memory_space<vmem>>, vector<1x4x1x8xf32>
    %16 = vector.shape_cast %15 : vector<1x4x1x8xf32> to vector<4x1x8xf32>
    %c0_27 = arith.constant 0 : index
    %c0_28 = arith.constant 0 : index
    %c0_29 = arith.constant 0 : index
    %c0_30 = arith.constant 0 : index
    %17 = vector.load %arg10[%c0_27, %c0_28, %c0_29, %c0_30] : memref<1x4x1x8xf32, #tpu.memory_space<vmem>>, vector<1x4x1x8xf32>
    %18 = vector.shape_cast %17 : vector<1x4x1x8xf32> to vector<4x1x8xf32>
    %c0_31 = arith.constant 0 : index
    %c0_32 = arith.constant 0 : index
    %c0_33 = arith.constant 0 : index
    %19 = vector.load %arg14[%c0_31, %c0_32, %c0_33] : memref<1x6x32xf32, #tpu.memory_space<vmem>>, vector<1x6x32xf32>
    %20 = vector.shape_cast %19 : vector<1x6x32xf32> to vector<6x32xf32>
    %21 = vector.extract_strided_slice %20 {offsets = [0, 0], sizes = [1, 32], strides = [1, 1]} : vector<6x32xf32> to vector<1x32xf32>
    %22 = vector.extract_strided_slice %20 {offsets = [1, 0], sizes = [1, 32], strides = [1, 1]} : vector<6x32xf32> to vector<1x32xf32>
    %23 = vector.extract_strided_slice %20 {offsets = [2, 0], sizes = [1, 32], strides = [1, 1]} : vector<6x32xf32> to vector<1x32xf32>
    %24 = vector.extract_strided_slice %20 {offsets = [3, 0], sizes = [1, 32], strides = [1, 1]} : vector<6x32xf32> to vector<1x32xf32>
    %25 = vector.extract_strided_slice %20 {offsets = [4, 0], sizes = [1, 32], strides = [1, 1]} : vector<6x32xf32> to vector<1x32xf32>
    %26 = vector.extract_strided_slice %20 {offsets = [5, 0], sizes = [1, 32], strides = [1, 1]} : vector<6x32xf32> to vector<1x32xf32>
    %27 = vector.shape_cast %4 : vector<8x32xf32> to vector<1x8x32xf32>
    %28 = vector.broadcast %27 : vector<1x8x32xf32> to vector<4x8x32xf32>
    "tpu.trace_start"() <{level = 10 : i32, message = "hsd,hdk->hsk"}> : () -> ()
    %cst = arith.constant dense<0.000000e+00> : vector<4x8x8xf32>
    %29 = tpu.matmul %28, %6, %cst {dimension_numbers = #tpu.dot_dimension_numbers<[2], [1], [1], [2], [0, 0, 0, 1, 1, 2], [0], [0]>} : vector<4x8x32xf32>, vector<4x32x8xf32>, vector<4x8x8xf32> -> vector<4x8x8xf32>
    "tpu.trace_stop"() : () -> ()
    %30 = vector.broadcast %14 : vector<4x1x8xf32> to vector<4x8x8xf32>
    %31 = arith.addf %29, %30 : vector<4x8x8xf32>
    %cst_34 = arith.constant 0.353553385 : f32
    %32 = vector.broadcast %cst_34 : f32 to vector<4x8x8xf32>
    %33 = arith.mulf %31, %32 : vector<4x8x8xf32>
    "tpu.trace_start"() <{level = 10 : i32, message = "hsd,hdk->hsk"}> : () -> ()
    %cst_35 = arith.constant dense<0.000000e+00> : vector<4x8x8xf32>
    %34 = tpu.matmul %28, %8, %cst_35 {dimension_numbers = #tpu.dot_dimension_numbers<[2], [1], [1], [2], [0, 0, 0, 1, 1, 2], [0], [0]>} : vector<4x8x32xf32>, vector<4x32x8xf32>, vector<4x8x8xf32> -> vector<4x8x8xf32>
    "tpu.trace_stop"() : () -> ()
    %35 = vector.broadcast %16 : vector<4x1x8xf32> to vector<4x8x8xf32>
    %36 = arith.addf %34, %35 : vector<4x8x8xf32>
    "tpu.trace_start"() <{level = 10 : i32, message = "hsd,hdk->hsk"}> : () -> ()
    %cst_36 = arith.constant dense<0.000000e+00> : vector<4x8x8xf32>
    %37 = tpu.matmul %28, %10, %cst_36 {dimension_numbers = #tpu.dot_dimension_numbers<[2], [1], [1], [2], [0, 0, 0, 1, 1, 2], [0], [0]>} : vector<4x8x32xf32>, vector<4x32x8xf32>, vector<4x8x8xf32> -> vector<4x8x8xf32>
    "tpu.trace_stop"() : () -> ()
    %38 = vector.broadcast %18 : vector<4x1x8xf32> to vector<4x8x8xf32>
    %39 = arith.addf %37, %38 : vector<4x8x8xf32>
    "tpu.trace_start"() <{level = 10 : i32, message = "hqd,hkd->hqk"}> : () -> ()
    %cst_37 = arith.constant dense<0.000000e+00> : vector<4x8x8xf32>
    %40 = tpu.matmul %33, %36, %cst_37 {dimension_numbers = #tpu.dot_dimension_numbers<[2], [2], [1], [1], [0, 0, 0, 1, 1, 1], [0], [0]>} : vector<4x8x8xf32>, vector<4x8x8xf32>, vector<4x8x8xf32> -> vector<4x8x8xf32>
    "tpu.trace_stop"() : () -> ()
    %cst_38 = arith.constant dense<0xFF800000> : vector<4x8xf32>
    %41 = vector.multi_reduction <maximumf>, %40, %cst_38 [2] : vector<4x8x8xf32> to vector<4x8xf32>
    %42 = vector.shape_cast %41 : vector<4x8xf32> to vector<4x8x1xf32>
    %43 = vector.broadcast %42 : vector<4x8x1xf32> to vector<4x8x8xf32>
    %44 = arith.subf %40, %43 : vector<4x8x8xf32>
    %45 = math.exp %44 : vector<4x8x8xf32>
    %cst_39 = arith.constant dense<0.000000e+00> : vector<4x8xf32>
    %46 = vector.multi_reduction <add>, %45, %cst_39 [2] : vector<4x8x8xf32> to vector<4x8xf32>
    %47 = vector.shape_cast %46 : vector<4x8xf32> to vector<4x8x1xf32>
    %48 = tpu.reciprocal %47 {approx = true} : vector<4x8x1xf32> -> vector<4x8x1xf32>
    %49 = vector.broadcast %48 : vector<4x8x1xf32> to vector<4x8x8xf32>
    %50 = arith.mulf %45, %49 : vector<4x8x8xf32>
    "tpu.trace_start"() <{level = 10 : i32, message = "hqk,hkd->hqd"}> : () -> ()
    %cst_40 = arith.constant dense<0.000000e+00> : vector<4x8x8xf32>
    %51 = tpu.matmul %50, %39, %cst_40 {dimension_numbers = #tpu.dot_dimension_numbers<[2], [1], [1], [2], [0, 0, 0, 1, 1, 2], [0], [0]>} : vector<4x8x8xf32>, vector<4x8x8xf32>, vector<4x8x8xf32> -> vector<4x8x8xf32>
    "tpu.trace_stop"() : () -> ()
    "tpu.trace_start"() <{level = 10 : i32, message = "hqd,hdn->hqn"}> : () -> ()
    %cst_41 = arith.constant dense<0.000000e+00> : vector<4x8x32xf32>
    %52 = tpu.matmul %51, %12, %cst_41 {dimension_numbers = #tpu.dot_dimension_numbers<[2], [1], [1], [2], [0, 0, 0, 1, 1, 2], [0], [0]>} : vector<4x8x8xf32>, vector<4x8x32xf32>, vector<4x8x32xf32> -> vector<4x8x32xf32>
    "tpu.trace_stop"() : () -> ()
    %cst_42 = arith.constant dense<0.000000e+00> : vector<8x32xf32>
    %53 = vector.multi_reduction <add>, %52, %cst_42 [0] : vector<4x8x32xf32> to vector<8x32xf32>
    %54 = vector.broadcast %21 : vector<1x32xf32> to vector<8x32xf32>
    %55 = arith.addf %53, %54 : vector<8x32xf32>
    %56 = arith.addf %4, %55 : vector<8x32xf32>
    %cst_43 = arith.constant dense<0.000000e+00> : vector<8xf32>
    %57 = vector.multi_reduction <add>, %56, %cst_43 [1] : vector<8x32xf32> to vector<8xf32>
    %58 = vector.shape_cast %57 : vector<8xf32> to vector<8x1xf32>
    %cst_44 = arith.constant 3.200000e+01 : f32
    %59 = vector.broadcast %cst_44 : f32 to vector<8x1xf32>
    %60 = arith.divf %58, %59 : vector<8x1xf32>
    %61 = vector.broadcast %60 : vector<8x1xf32> to vector<8x32xf32>
    %62 = arith.subf %56, %61 : vector<8x32xf32>
    %63 = arith.mulf %62, %62 : vector<8x32xf32>
    %cst_45 = arith.constant dense<0.000000e+00> : vector<8xf32>
    %64 = vector.multi_reduction <add>, %63, %cst_45 [1] : vector<8x32xf32> to vector<8xf32>
    %65 = vector.shape_cast %64 : vector<8xf32> to vector<8x1xf32>
    %cst_46 = arith.constant 3.200000e+01 : f32
    %66 = vector.broadcast %cst_46 : f32 to vector<8x1xf32>
    %67 = arith.divf %65, %66 : vector<8x1xf32>
    %68 = vector.broadcast %60 : vector<8x1xf32> to vector<8x32xf32>
    %69 = arith.subf %56, %68 : vector<8x32xf32>
    %cst_47 = arith.constant 9.99999974E-6 : f32
    %70 = vector.broadcast %cst_47 : f32 to vector<8x1xf32>
    %71 = arith.addf %67, %70 : vector<8x1xf32>
    %72 = math.rsqrt %71 : vector<8x1xf32>
    %73 = vector.broadcast %72 : vector<8x1xf32> to vector<8x32xf32>
    %74 = arith.mulf %69, %73 : vector<8x32xf32>
    %75 = vector.broadcast %22 : vector<1x32xf32> to vector<8x32xf32>
    %76 = arith.mulf %74, %75 : vector<8x32xf32>
    %77 = vector.broadcast %23 : vector<1x32xf32> to vector<8x32xf32>
    %78 = arith.addf %76, %77 : vector<8x32xf32>
    %c0_48 = arith.constant 0 : index
    %c0_49 = arith.constant 0 : index
    %c0_50 = arith.constant 0 : index
    %79 = vector.load %arg11[%c0_48, %c0_49, %c0_50] : memref<1x32x64xf32, #tpu.memory_space<vmem>>, vector<1x32x64xf32>
    %80 = vector.shape_cast %79 : vector<1x32x64xf32> to vector<32x64xf32>
    %cst_51 = arith.constant dense<0.000000e+00> : vector<8x64xf32>
    %81 = tpu.matmul %78, %80, %cst_51 {dimension_numbers = #tpu.dot_dimension_numbers<[1], [0], [0], [1], [0, 0, 1, 1], [], []>} : vector<8x32xf32>, vector<32x64xf32>, vector<8x64xf32> -> vector<8x64xf32>
    %c0_52 = arith.constant 0 : index
    %c0_53 = arith.constant 0 : index
    %c0_54 = arith.constant 0 : index
    %82 = vector.load %arg12[%c0_52, %c0_53, %c0_54] : memref<1x1x64xf32, #tpu.memory_space<vmem>>, vector<1x1x64xf32>
    %83 = vector.shape_cast %82 : vector<1x1x64xf32> to vector<1x64xf32>
    %84 = vector.broadcast %83 : vector<1x64xf32> to vector<8x64xf32>
    %85 = arith.addf %81, %84 : vector<8x64xf32>
    %cst_55 = arith.constant 0.000000e+00 : f32
    %86 = vector.broadcast %cst_55 : f32 to vector<8x64xf32>
    %87 = arith.maximumf %85, %86 : vector<8x64xf32>
    %c0_56 = arith.constant 0 : index
    %c0_57 = arith.constant 0 : index
    %c0_58 = arith.constant 0 : index
    %88 = vector.load %arg13[%c0_56, %c0_57, %c0_58] : memref<1x64x32xf32, #tpu.memory_space<vmem>>, vector<1x64x32xf32>
    %89 = vector.shape_cast %88 : vector<1x64x32xf32> to vector<64x32xf32>
    %cst_59 = arith.constant dense<0.000000e+00> : vector<8x32xf32>
    %90 = tpu.matmul %87, %89, %cst_59 {dimension_numbers = #tpu.dot_dimension_numbers<[1], [0], [0], [1], [0, 0, 1, 1], [], []>} : vector<8x64xf32>, vector<64x32xf32>, vector<8x32xf32> -> vector<8x32xf32>
    %91 = vector.broadcast %24 : vector<1x32xf32> to vector<8x32xf32>
    %92 = arith.addf %90, %91 : vector<8x32xf32>
    %93 = arith.addf %78, %92 : vector<8x32xf32>
    %cst_60 = arith.constant dense<0.000000e+00> : vector<8xf32>
    %94 = vector.multi_reduction <add>, %93, %cst_60 [1] : vector<8x32xf32> to vector<8xf32>
    %95 = vector.shape_cast %94 : vector<8xf32> to vector<8x1xf32>
    %cst_61 = arith.constant 3.200000e+01 : f32
    %96 = vector.broadcast %cst_61 : f32 to vector<8x1xf32>
    %97 = arith.divf %95, %96 : vector<8x1xf32>
    %98 = vector.broadcast %97 : vector<8x1xf32> to vector<8x32xf32>
    %99 = arith.subf %93, %98 : vector<8x32xf32>
    %100 = arith.mulf %99, %99 : vector<8x32xf32>
    %cst_62 = arith.constant dense<0.000000e+00> : vector<8xf32>
    %101 = vector.multi_reduction <add>, %100, %cst_62 [1] : vector<8x32xf32> to vector<8xf32>
    %102 = vector.shape_cast %101 : vector<8xf32> to vector<8x1xf32>
    %cst_63 = arith.constant 3.200000e+01 : f32
    %103 = vector.broadcast %cst_63 : f32 to vector<8x1xf32>
    %104 = arith.divf %102, %103 : vector<8x1xf32>
    %105 = vector.broadcast %97 : vector<8x1xf32> to vector<8x32xf32>
    %106 = arith.subf %93, %105 : vector<8x32xf32>
    %cst_64 = arith.constant 9.99999974E-6 : f32
    %107 = vector.broadcast %cst_64 : f32 to vector<8x1xf32>
    %108 = arith.addf %104, %107 : vector<8x1xf32>
    %109 = math.rsqrt %108 : vector<8x1xf32>
    %110 = vector.broadcast %109 : vector<8x1xf32> to vector<8x32xf32>
    %111 = arith.mulf %106, %110 : vector<8x32xf32>
    %112 = vector.broadcast %25 : vector<1x32xf32> to vector<8x32xf32>
    %113 = arith.mulf %111, %112 : vector<8x32xf32>
    %114 = vector.broadcast %26 : vector<1x32xf32> to vector<8x32xf32>
    %115 = arith.addf %113, %114 : vector<8x32xf32>
    %c0_65 = arith.constant 0 : index
    %c0_66 = arith.constant 0 : index
    %c0_67 = arith.constant 0 : index
    %116 = vector.load %arg15[%c0_65, %c0_66, %c0_67] : memref<1x8x32xf32, #tpu.memory_space<vmem>>, vector<1x8x32xf32>
    %117 = vector.shape_cast %116 : vector<1x8x32xf32> to vector<8x32xf32>
    %118 = vector.shape_cast %115 : vector<8x32xf32> to vector<1x8x32xf32>
    tpu.vector_store %arg15[%c0_65, %c0_66, %c0_67], %118 {strides = array<i32>} : memref<1x8x32xf32, #tpu.memory_space<vmem>>, vector<1x8x32xf32>,
    return
  }
  func.func @transform_0(%arg0: i32, %arg1: i32) -> (i32, i32, i32) {
    %c0_i32 = arith.constant 0 : i32
    %c0_i32_0 = arith.constant 0 : i32
    %c0_i32_1 = arith.constant 0 : i32
    return %arg0, %c0_i32, %c0_i32_0 : i32, i32, i32
  }
  func.func @transform_1(%arg0: i32, %arg1: i32) -> (i32, i32, i32) {
    %c0_i32 = arith.constant 0 : i32
    %c0_i32_0 = arith.constant 0 : i32
    %c0_i32_1 = arith.constant 0 : i32
    %c0_i32_2 = arith.constant 0 : i32
    return %c0_i32, %c0_i32_0, %c0_i32_1 : i32, i32, i32
  }
  func.func @transform_2(%arg0: i32, %arg1: i32) -> (i32, i32, i32, i32) {
    %c0_i32 = arith.constant 0 : i32
    %c0_i32_0 = arith.constant 0 : i32
    %c0_i32_1 = arith.constant 0 : i32
    %c0_i32_2 = arith.constant 0 : i32
    return %arg1, %c0_i32, %c0_i32_0, %c0_i32_1 : i32, i32, i32, i32
  }
  func.func @transform_3(%arg0: i32, %arg1: i32) -> (i32, i32, i32, i32) {
    %c0_i32 = arith.constant 0 : i32
    %c0_i32_0 = arith.constant 0 : i32
    %c0_i32_1 = arith.constant 0 : i32
    %c0_i32_2 = arith.constant 0 : i32
    return %arg1, %c0_i32, %c0_i32_0, %c0_i32_1 : i32, i32, i32, i32
  }
  func.func @transform_4(%arg0: i32, %arg1: i32) -> (i32, i32, i32, i32) {
    %c0_i32 = arith.constant 0 : i32
    %c0_i32_0 = arith.constant 0 : i32
    %c0_i32_1 = arith.constant 0 : i32
    %c0_i32_2 = arith.constant 0 : i32
    return %arg1, %c0_i32, %c0_i32_0, %c0_i32_1 : i32, i32, i32, i32
  }
  func.func @transform_5(%arg0: i32, %arg1: i32) -> (i32, i32, i32, i32) {
    %c0_i32 = arith.constant 0 : i32
    %c0_i32_0 = arith.constant 0 : i32
    %c0_i32_1 = arith.constant 0 : i32
    %c0_i32_2 = arith.constant 0 : i32
    return %arg1, %c0_i32, %c0_i32_0, %c0_i32_1 : i32, i32, i32, i32
  }
  func.func @transform_6(%arg0: i32, %arg1: i32) -> (i32, i32, i32, i32) {
    %c0_i32 = arith.constant 0 : i32
    %c0_i32_0 = arith.constant 0 : i32
    %c0_i32_1 = arith.constant 0 : i32
    %c0_i32_2 = arith.constant 0 : i32
    return %arg1, %c0_i32, %c0_i32_0, %c0_i32_1 : i32, i32, i32, i32
  }
  func.func @transform_7(%arg0: i32, %arg1: i32) -> (i32, i32, i32, i32) {
    %c0_i32 = arith.constant 0 : i32
    %c0_i32_0 = arith.constant 0 : i32
    %c0_i32_1 = arith.constant 0 : i32
    %c0_i32_2 = arith.constant 0 : i32
    return %arg1, %c0_i32, %c0_i32_0, %c0_i32_1 : i32, i32, i32, i32
  }
  func.func @transform_8(%arg0: i32, %arg1: i32) -> (i32, i32, i32, i32) {
    %c0_i32 = arith.constant 0 : i32
    %c0_i32_0 = arith.constant 0 : i32
    %c0_i32_1 = arith.constant 0 : i32
    %c0_i32_2 = arith.constant 0 : i32
    return %arg1, %c0_i32, %c0_i32_0, %c0_i32_1 : i32, i32, i32, i32
  }
  func.func @transform_9(%arg0: i32, %arg1: i32) -> (i32, i32, i32) {
    %c0_i32 = arith.constant 0 : i32
    %c0_i32_0 = arith.constant 0 : i32
    %c0_i32_1 = arith.constant 0 : i32
    return %arg1, %c0_i32, %c0_i32_0 : i32, i32, i32
  }
  func.func @transform_10(%arg0: i32, %arg1: i32) -> (i32, i32, i32) {
    %c0_i32 = arith.constant 0 : i32
    %c0_i32_0 = arith.constant 0 : i32
    %c0_i32_1 = arith.constant 0 : i32
    return %arg1, %c0_i32, %c0_i32_0 : i32, i32, i32
  }
  func.func @transform_11(%arg0: i32, %arg1: i32) -> (i32, i32, i32) {
    %c0_i32 = arith.constant 0 : i32
    %c0_i32_0 = arith.constant 0 : i32
    %c0_i32_1 = arith.constant 0 : i32
    return %arg1, %c0_i32, %c0_i32_0 : i32, i32, i32
  }
  func.func @transform_12(%arg0: i32, %arg1: i32) -> (i32, i32, i32) {
    %c0_i32 = arith.constant 0 : i32
    %c0_i32_0 = arith.constant 0 : i32
    %c0_i32_1 = arith.constant 0 : i32
    return %arg1, %c0_i32, %c0_i32_0 : i32, i32, i32
  }
  func.func @transform_13(%arg0: i32, %arg1: i32) -> (i32, i32, i32) {
    %c0_i32 = arith.constant 0 : i32
    %c0_i32_0 = arith.constant 0 : i32
    %c0_i32_1 = arith.constant 0 : i32
    return %arg0, %c0_i32, %c0_i32_0 : i32, i32, i32
  }
}

</mosaic_0001>

<bundles_post_ra>
// kernel: tpu_custom_call.1
= control target key start
LH: loop header
LB: loop body
LE: loop exit
PB: predicated region body
PF: predicated region fallthrough
CT: control target
= control target key end

     0   :  { %s2382_s0 = inlined_call_operand.vmem [shape: f32[2,8,32], index: 0, kind: input, shape index: {}]   ;;  %s2383_s1 = inlined_call_operand.vmem [shape: f32[1,8,32], index: 1, kind: input, shape index: {}]   ;;  %s2384_s2 = inlined_call_operand.vmem [shape: f32[2,4,32,8], index: 2, kind: input, shape index: {}]   ;;  %s2385_s3 = inlined_call_operand.vmem [shape: f32[2,4,32,8], index: 3, kind: input, shape index: {}]   ;;  %s2386_s4 = inlined_call_operand.vmem [shape: f32[2,4,32,8], index: 4, kind: input, shape index: {}]   ;;  %s2387_s5 = inlined_call_operand.vmem [shape: f32[2,4,8,32], index: 5, kind: input, shape index: {}]   ;;  %s2388_s6 = inlined_call_operand.vmem [shape: f32[2,4,1,8], index: 6, kind: input, shape index: {}]   ;;  %s2389_s7 = inlined_call_operand.vmem [shape: f32[2,4,1,8], index: 7, kind: input, shape index: {}]   ;;  %s2390_s8 = inlined_call_operand.vmem [shape: f32[2,4,1,8], index: 8, kind: input, shape index: {}]   ;;  %s2391_s9 = inlined_call_operand.vmem [shape: f32[2,32,64], index: 9, kind: input, shape index: {}]   ;;  %s2392_s10 = inlined_call_operand.vmem [shape: f32[2,1,64], index: 10, kind: input, shape index: {}]   ;;  %s2393_s11 = inlined_call_operand.vmem [shape: f32[2,64,32], index: 11, kind: input, shape index: {}]   ;;  %s2394_s12 = inlined_call_operand.vmem [shape: f32[2,6,32], index: 12, kind: input, shape index: {}]   ;;  %s2395_s13 = inlined_call_operand.hbm [shape: f32[2,8,32], index: 13, kind: output, shape index: {}]  }
   0x1   :  { %2412 = sst [smem:[#allocation19_spill]] %s2382_s0 }
   0x2   :  { %2413 = sst [smem:[#allocation20_spill]] %s2384_s2 }
   0x3   :  { %2414 = sst [smem:[#allocation21_spill]] %s2385_s3 }
   0x4   :  { %2415 = sst [smem:[#allocation22_spill]] %s2386_s4 }
   0x5   :  { %2416 = sst [smem:[#allocation23_spill]] %s2387_s5 }
   0x6   :  { %2417 = sst [smem:[#allocation24_spill]] %s2388_s6 }
   0x7   :  { %2418 = sst [smem:[#allocation25_spill]] %s2389_s7 }
   0x8   :  { %2419 = sst [smem:[#allocation26_spill]] %s2395_s13 }
   0x9   :  { %18 = vsyncpa [#allocation3], 0 }
   0xa   :  { %20 = vsyncpa [#allocation3 + $0x1], 0  ;;  %s2031_s25 = smov 0   ;;  %s2033_s26 = smov 0  }
   0xb   :  { %s2035_s27 = smov 0   ;;  %s2037_s28 = smov 0  }
   0xc   :  { %s2039_s29 = smov 0   ;;  %s2041_s30 = smov 0  }
   0xd   :  { %s2043_s14 = smov 0   ;;  %s2045_s15 = smov 0  }
   0xe LB: > { %2420 = sst [smem:[#allocation5_spill]] %s1930_s25  ;;  %s1693_s16 = sadd.s32 4294967295, %s1958_s15   ;;  %s1958_s15 = sphi %s2045_s15, %s26_s15   ;;  %s1954_s14 = sphi %s2043_s14, %s2459_s14   ;;  %s1950_s30 = sphi %s2041_s30, %s2458_s30   ;;  %s1946_s29 = sphi %s2039_s29, %s2457_s29   ;;  %s1942_s28 = sphi %s2037_s28, %s2456_s28   ;;  %s1938_s27 = sphi %s2035_s27, %s2455_s27   ;;  %s1934_s26 = sphi %s2033_s26, %s2454_s26   ;;  %s1930_s25 = sphi %s2031_s25, %s2453_s25  }
   0xf   : > { %2421 = sst [smem:[#allocation6_spill]] %s1934_s26  ;;  %s1694_s17 = sadd.s32 4294967294, %s1958_s15  }
  0x10   : > { %2422 = sst [smem:[#allocation7_spill]] %s1938_s27  ;;  %s35_s18 = sadd.s32 1, %s1950_s30 }
  0x11   : > { %2423 = sst [smem:[#allocation8_spill]] %s1946_s29  ;;  %p36_p0 = scmp.ge.s32.totalorder %s35_s18, 2 }
  0x12   : > { %2424 = sst [smem:[#allocation9_spill]] %s1950_s30  ;;  %s38_s19 = sadd.s32 1, %s1954_s14 }
  0x13   : > { %2425 = sst [smem:[#allocation10_spill]] %s1954_s14  ;;  %p388_p1 = scmp.ne.s32.totalorder %s1938_s27, %s1934_s26 }
  0x14   : > { %2426 = sst [smem:[#allocation11_spill]] %s1958_s15  ;;  %p389_p2 = scmp.eq.s32.totalorder %s1693_s16, 3 }
  0x15   : > { %s2461_s18 = smov (%p36_p0, %s35_s18), 0  ;;  %s2463_s19 = smov (!%p36_p0, %s38_s19), %s1954_s14 }
  0x16   : > { %2427 = sst [smem:[#allocation12_spill]] %s2461_s18  ;;  %p2080_p3 = por %p389_p2, %p388_p1 }
  0x17   : > { %p394_p4 = scmp.ne.s32.totalorder %s1934_s26, %s1930_s25  ;;  %p40_p5 = scmp.ge.s32.totalorder %s2463_s19, 2 }
  0x18   : > { %s2428_s20 = scalar_select %p2080_p3, 1, 0 }
  0x19   : > { %p395_p6 = scmp.eq.s32.totalorder %s1694_s17, 3  ;;  %p1697_p7 = scmp.ge.s32.totalorder %s1958_s15, 1 }
  0x1a   : > { %2429 = sst [smem:[#allocation13_spill]] %s2428_s20  ;;  %p505_p8 = scmp.lt.s32.totalorder %s1958_s15, 5 }
  0x1b   : > { %s2465_s19 = smov (%p40_p5, %s2463_s19), 0  ;;  %p2090_p9 = por %p395_p6, %p394_p4 }
  0x1c   : > { %2430 = sst [smem:[#allocation14_spill]] %s2465_s19  ;;  %p506_p10 = pnand %p1697_p7, %p505_p8 }
  0x1d   : > { %s2431_s21 = scalar_select %p2090_p9, 1, 0 }
  0x1e   : > { %s375_s22 = ssub.s32 %s1954_s14, %s2465_s19  ;;  %s378_s23 = sadd.s32 1, %s1938_s27 }
  0x1f   : > { %2432 = sst [smem:[#allocation15_spill]] %s2431_s21  ;;  %p376_p11 = scmp.eq.s32.totalorder %s375_s22, 0 }
  0x20   : > { %509 = sbr.rel (%p506_p10) target bundleno = 1693 (0x69d), region = 72 }
  0x21   : > { %s2098_s24 = scalar_select %p376_p11, %s1938_s27, %s378_s23  }
  0x23   : > { %2433 = sst [smem:[#allocation16_spill]] %s2098_s24 }
  0x25   : > { %s2401_s16 = sand.u32 1, %s1934_s26   ;;  %p597_p12 = scmp.lt.s32.totalorder %s1946_s29, 1 }
  0x26   : > { %s1698_s17 = sshll.u32 %s2401_s16, 3  ;;  %p601_p13 = scmp.lt.s32.totalorder %s1942_s28, 1 }
  0x27   : > { %s598_s18 = scalar_select %p597_p12, %s1946_s29, 1 }
  0x28   : > { %s2107_s30 = scalar_select %p601_p13, %s1942_s28, 1 }
  0x29   : > { %s1699_s22 = sshll.u32 %s598_s18, 3  ;;  %s2434_s0 = sld [smem:[#allocation19_spill]] }
  0x2a   : > { %s1751_s24 = sshll.u32 %s2107_s30, 7  ;;  %s2435_s2 = sld [smem:[#allocation20_spill]] }
  0x2b   : > { %s2436_s3 = sld [smem:[#allocation21_spill]]  ;;  %s1754_s29 = sshll.u32 %s2107_s30, 5 }
  0x2c   : > { %s2437_s4 = sld [smem:[#allocation22_spill]]  ;;  %s2153_s23 = scalar_lea.vmem %s2391_s9, %s1754_s29 }
  0x2d   : > { %s2438_s5 = sld [smem:[#allocation23_spill]]  ;;  %s640_s27 = scalar_lea.vmem %s2392_s10, %s2107_s30 }
  0x2e   : > { %s2440_s6 = sld [smem:[#allocation24_spill]]  ;;  %s1756_s21 = sshll.u32 %s2107_s30, 6 }
  0x2f   : > { %s600_s14 = scalar_lea.vmem %s2434_s0, %s1699_s22  ;;  %s1708_s0 = sshll.u32 %s2107_s30, 2 }
  0x30   : > { %s2116_s16 = scalar_lea.vmem %s2435_s2, %s1751_s24  ;;  %s2442_s7 = sld [smem:[#allocation25_spill]] }
  0x31   : > { %s2121_s20 = scalar_lea.vmem %s2436_s3, %s1751_s24  ;;  %s2163_s25 = scalar_lea.vmem %s2393_s11, %s1756_s21 }
  0x32   : > { %s2126_s18 = scalar_lea.vmem %s2437_s4, %s1751_s24  ;;  %s2148_s24 = scalar_lea.vmem %s2390_s8, %s1708_s0 }
  0x33   : > { %s2132_s22 = scalar_lea.vmem %s2438_s5, %s1754_s29  ;;  %s1715_s15 = sshll.u32 %s2107_s30, 3 }
  0x34   : > { %2439 = sst [smem:[#allocation17_spill]] %s2132_s22  ;;  %s2138_s2 = scalar_lea.vmem %s2440_s6, %s1708_s0 }
  0x35   : > { %2441 = sst [smem:[#allocation18_spill]] %s2138_s2  ;;  %s2171_s26 = scalar_lea.vmem [#allocation2], %s1698_s17 }
  0x36   : > { %s2143_s3 = scalar_lea.vmem %s2442_s7, %s1708_s0  ;;  %s2169_s0 = scalar_lea.vmem %s2394_s12, %s1715_s15 }
  0x37   : > { %p1716_p0 = scmp.ne.s32.totalorder %s1942_s28, 0 }
  0x39   : > { %653 = sbr.rel (%p1716_p0) target bundleno = 67 (0x43), region = 76 }
  0x3e   : > { %v654_v0 = vld [vmem:[%s600_s14] sm:$0xff]  ;;  %vm657_vm0 = vcmask 261120  }
  0x3f   : > { %v655_v1 = vld [vmem:[%s2383_s1] sm:$0xff] }
  0x40   : > { %v656_v2 = vadd.f32 %v655_v1, %v654_v0 }
  0x42   : > { %658 = vst.msk [vmem:[%s2171_s26] sm:$0xff] %vm657_vm0, %v656_v2 }
  0x43 PF: > { %v663_v3 = vld [vmem:[%s2116_s16 + $0x18] sm:$0xff]  ;;  %v662_v5 = vld [vmem:[%s2116_s16 + $0x10] sm:$0xff]  ;;  %v661_v7 = vld [vmem:[%s2116_s16 + $0x8] sm:$0xff]  ;;  %vm737_vm1 = vcmask 261120   ;;  %s2443_s2 = sld [smem:[#allocation18_spill]]  ;;  %vm1009_vm2 = vcmask 64512  }
  0x44   : > { %v667_v4 = vld [vmem:[%s2116_s16 + $0x38] sm:$0xff]  ;;  %753 = vmatpush.msra.mxu0 %v663_v3  ;;  %v666_v6 = vld [vmem:[%s2116_s16 + $0x30] sm:$0xff]  ;;  %v665_v8 = vld [vmem:[%s2116_s16 + $0x28] sm:$0xff]  ;;  %vm1426_vm7 = vcmask 523264   ;;  %s2445_s28 = sld [smem:[#allocation8_spill]]  ;;  %s1491_s22 = sshll.u32 %s2171_s26, 4  ;;  %s1492_s22 = int_to_ptr.vmem [resolvable:$true] %s1491_s22 }
  0x45   : > { %773 = vmatpush.msra.mxu2 %v667_v4  ;;  %v683_v9 = vld [vmem:[%s2121_s20 + $0x38] sm:$0xff]  ;;  %v682_v11 = vld [vmem:[%s2121_s20 + $0x30] sm:$0xff]  ;;  %v660_v12 = vld [vmem:[%s2116_s16] sm:$0xff]  ;;  %s2446_s30 = sld [smem:[#allocation6_spill]] }
  0x46   : > { %754 = vmatpush.msra.mxu0 %v662_v5  ;;  %v675_v10 = vld [vmem:[%s2116_s16 + $0x78] sm:$0xff]  ;;  %869 = vmatpush.msra.mxu1 %v683_v9  ;;  %v664_v13 = vld [vmem:[%s2116_s16 + $0x20] sm:$0xff]  ;;  %v674_v14 = vld [vmem:[%s2116_s16 + $0x70] sm:$0xff] }
  0x47   : > { %774 = vmatpush.msra.mxu2 %v666_v6  ;;  %813 = vmatpush.msra.mxu3 %v675_v10  ;;  %v671_v16 = vld [vmem:[%s2116_s16 + $0x58] sm:$0xff]  ;;  %v681_v18 = vld [vmem:[%s2121_s20 + $0x28] sm:$0xff]  ;;  %v670_v20 = vld [vmem:[%s2116_s16 + $0x50] sm:$0xff] }
  0x48   : > { %755 = vmatpush.msra.mxu0 %v661_v7  ;;  %870 = vmatpush.msra.mxu1 %v682_v11  ;;  %v679_v17 = vld [vmem:[%s2121_s20 + $0x18] sm:$0xff]  ;;  %v673_v19 = vld [vmem:[%s2116_s16 + $0x68] sm:$0xff]  ;;  %v678_v21 = vld [vmem:[%s2121_s20 + $0x10] sm:$0xff] }
  0x49   : > { %775 = vmatpush.msra.mxu2 %v665_v8  ;;  %v2191_v15 = vld [vmem:[%s2171_s26] sm:$0xff]  ;;  %814 = vmatpush.msra.mxu3 %v674_v14  ;;  %v691_v28 = vld [vmem:[%s2121_s20 + $0x78] sm:$0xff]  ;;  %v690_v32 = vld [vmem:[%s2121_s20 + $0x70] sm:$0xff] }
  0x4a   : > { %756 = vmatpush.msra.mxu0 %v660_v12  ;;  %v680_v22 = vld [vmem:[%s2121_s20 + $0x20] sm:$0xff]  ;;  %871 = vmatpush.msra.mxu1 %v681_v18  ;;  %v669_v24 = vld [vmem:[%s2116_s16 + $0x48] sm:$0xff]  ;;  %v687_v29 = vld [vmem:[%s2121_s20 + $0x58] sm:$0xff]  ;;  %s1748_s29 = sshll.u32 %s2445_s28, 3 }
  0x4b   : > { %776 = vmatpush.msra.mxu2 %v664_v13  ;;  %1717 = vmatmul.msk.f32.vlgmr.msra.gmra.mxu0 %vm737_vm1, %v2191_v15  ;;  %v672_v23 = vld [vmem:[%s2116_s16 + $0x60] sm:$0xff]  ;;  %v677_v25 = vld [vmem:[%s2121_s20 + $0x8] sm:$0xff]  ;;  %v699_v30 = vld [vmem:[%s2126_s18 + $0x38] sm:$0xff]  ;;  %s2449_s19 = sand.u32 1, %s2446_s30  }
  0x4c   : > { %1718 = vmatmul.msk.f32.vlgmr.msra.gmra.mxu2 %vm737_vm1, %v2191_v15  ;;  %849 = vmatpush.msrb.mxu0 %v679_v17  ;;  %v668_v26 = vld [vmem:[%s2116_s16 + $0x40] sm:$0xff]  ;;  %v695_v31 = vld [vmem:[%s2126_s18 + $0x18] sm:$0xff]  ;;  %v686_v33 = vld [vmem:[%s2121_s20 + $0x50] sm:$0xff]  ;;  %s2447_s16 = sld [smem:[#allocation26_spill]] }
  0x4d   : > { %793 = vmatpush.msrb.mxu2 %v671_v16  ;;  %815 = vmatpush.msra.mxu3 %v673_v19  ;;  %v676_v27 = vld [vmem:[%s2121_s20] sm:$0xff]  ;;  %v698_v34 = vld [vmem:[%s2126_s18 + $0x30] sm:$0xff]  ;;  %v689_v35 = vld [vmem:[%s2121_s20 + $0x68] sm:$0xff] }
  0x4e   : > { %850 = vmatpush.msrb.mxu0 %v678_v21  ;;  %872 = vmatpush.msra.mxu1 %v680_v22  ;;  %v685_v36 = vld [vmem:[%s2121_s20 + $0x48] sm:$0xff]  ;;  %v688_v37 = vld [vmem:[%s2121_s20 + $0x60] sm:$0xff]  ;;  %v694_v40 = vld [vmem:[%s2126_s18 + $0x10] sm:$0xff] }
  0x4f   : > { %794 = vmatpush.msrb.mxu2 %v670_v20  ;;  %816 = vmatpush.msra.mxu3 %v672_v23  ;;  %v684_v38 = vld [vmem:[%s2121_s20 + $0x40] sm:$0xff]  ;;  %v697_v39 = vld [vmem:[%s2126_s18 + $0x28] sm:$0xff]  ;;  %v707_v44 = vld [vmem:[%s2126_s18 + $0x78] sm:$0xff] }
  0x50   : > { %851 = vmatpush.msrb.mxu0 %v677_v25  ;;  %1722 = vmatmul.msk.f32.vlgmr.msra.gmra.mxu1 %vm737_vm1, %v2191_v15  ;;  %v696_v41 = vld [vmem:[%s2126_s18 + $0x20] sm:$0xff]  ;;  %v693_v42 = vld [vmem:[%s2126_s18 + $0x8] sm:$0xff]  ;;  %v703_v45 = vld [vmem:[%s2126_s18 + $0x58] sm:$0xff] }
  0x51   : > { %795 = vmatpush.msrb.mxu2 %v669_v24  ;;  %1720 = vmatmul.msk.f32.vlgmr.msra.gmra.mxu3 %vm737_vm1, %v2191_v15  ;;  %v692_v43 = vld [vmem:[%s2126_s18] sm:$0xff]  ;;  %v706_v46 = vld [vmem:[%s2126_s18 + $0x70] sm:$0xff]  ;;  %v705_v48 = vld [vmem:[%s2126_s18 + $0x68] sm:$0xff] }
  0x52   : > { %852 = vmatpush.msrb.mxu0 %v676_v27  ;;  %909 = vmatpush.msrb.mxu3 %v691_v28  ;;  %v702_v47 = vld [vmem:[%s2126_s18 + $0x50] sm:$0xff]  ;;  %v701_v49 = vld [vmem:[%s2126_s18 + $0x48] sm:$0xff]  ;;  %v704_v50 = vld [vmem:[%s2126_s18 + $0x60] sm:$0xff]  ;;  %s1489_s17 = scalar_lea.hbm %s2447_s16, %s1748_s29  ;;  %s1884_s13 = scalar_lea.hbm %s2447_s16, 16 }
  0x53   : > { %796 = vmatpush.msrb.mxu2 %v668_v26  ;;  %1721 = vmatmul.msk.f32.vlgmr.msrb.gmra.mxu0 %vm737_vm1, %v2191_v15  ;;  %v700_v51 = vld [vmem:[%s2126_s18 + $0x40] sm:$0xff] }
  0x54   : > { %1719 = vmatmul.msk.f32.vlgmr.msrb.gmra.mxu2 %vm737_vm1, %v2191_v15  ;;  %961 = vmatpush.msrb.mxu1 %v699_v30  ;;  %v1829_v53 = vld [vmem:[%s2443_s2] ss:$0 sm:$0xff]  ;;  %v1830_v54 = vld [vmem:[%s2143_s3 + $0x1] ss:$0 sm:$0xff]  ;;  %v1833_v4 = vld [vmem:[%s2443_s2 + $0x3] ss:$0 sm:$0xff] }
  0x55   : > { %889 = vmatpush.msra.mxu2 %v687_v29  ;;  %941 = vmatpush.msra.mxu0 %v695_v31  ;;  %v1831_v55 = vld [vmem:[%s2443_s2 + $0x1] ss:$0 sm:$0xff]  ;;  %v1832_v56 = vld [vmem:[%s2143_s3] ss:$0 sm:$0xff]  ;;  %v1834_v5 = vld [vmem:[%s2443_s2 + $0x2] ss:$0 sm:$0xff] }
  0x56   : > { %910 = vmatpush.msrb.mxu3 %v690_v32  ;;  %962 = vmatpush.msrb.mxu1 %v698_v34  ;;  %v1835_v6 = vld [vmem:[%s2143_s3 + $0x3] ss:$0 sm:$0xff]  ;;  %v1836_v7 = vld [vmem:[%s2143_s3 + $0x2] ss:$0 sm:$0xff]  ;;  %v1837_v17 = vld [vmem:[%s2148_s24 + $0x1] ss:$0 sm:$0xff] }
  0x57   : > { %890 = vmatpush.msra.mxu2 %v686_v33  ;;  %942 = vmatpush.msra.mxu0 %v694_v40  ;;  %v1838_v19 = vld [vmem:[%s2148_s24] ss:$0 sm:$0xff]  ;;  %v1839_v23 = vld [vmem:[%s2148_s24 + $0x3] ss:$0 sm:$0xff]  ;;  %v1840_v24 = vld [vmem:[%s2148_s24 + $0x2] ss:$0 sm:$0xff] }
  0x58   : > { %911 = vmatpush.msrb.mxu3 %v689_v35  ;;  %963 = vmatpush.msrb.mxu1 %v697_v39  ;;  %s2444_s3 = sld [smem:[#allocation17_spill]]  ;;  %s1493_s24 = sshll.u32 %s1489_s17, 4  ;;  %s1494_s24 = int_to_ptr.hbm [resolvable:$true] %s1493_s24 }
  0x59   : > { %891 = vmatpush.msra.mxu2 %v685_v36  ;;  %943 = vmatpush.msra.mxu0 %v693_v42 }
  0x5a   : > { %912 = vmatpush.msrb.mxu3 %v688_v37  ;;  %964 = vmatpush.msrb.mxu1 %v696_v41 }
  0x5b   : > { %892 = vmatpush.msra.mxu2 %v684_v38  ;;  %1724 = vmatmul.msk.f32.vlgmr.msrb.gmra.mxu3 %vm737_vm1, %v2191_v15 }
  0x5c   : > { %1723 = vmatmul.msk.f32.vlgmr.msra.gmra.mxu2 %vm737_vm1, %v2191_v15  ;;  %1726 = vmatmul.msk.f32.vlgmr.msrb.gmra.mxu1 %vm737_vm1, %v2191_v15 }
  0x5d   : > { %944 = vmatpush.msra.mxu0 %v692_v43  ;;  %1001 = vmatpush.msra.mxu3 %v707_v44 }
  0x5e   : > { %1725 = vmatmul.msk.f32.vlgmr.msra.gmra.mxu0 %vm737_vm1, %v2191_v15  ;;  %981 = vmatpush.msrb.mxu2 %v703_v45 }
  0x5f   : > { %1002 = vmatpush.msra.mxu3 %v706_v46 }
  0x60   : > { %982 = vmatpush.msrb.mxu2 %v702_v47 }
  0x61   : > { %1003 = vmatpush.msra.mxu3 %v705_v48 }
  0x62   : > { %983 = vmatpush.msrb.mxu2 %v701_v49 }
  0x63   : > { %1004 = vmatpush.msra.mxu3 %v704_v50 }
  0x64   : > { %984 = vmatpush.msrb.mxu2 %v700_v51  ;;  %1728 = vmatmul.msk.f32.vlgmr.msra.gmra.mxu3 %vm737_vm1, %v2191_v15 }
  0x65   : > { %1727 = vmatmul.msk.f32.vlgmr.msrb.gmra.mxu2 %vm737_vm1, %v2191_v15 }
  0xc8   : > { %v758_v52 = vpop.f32.mrf.mxu0 }
  0xc9   : > { %v759_v57 = vadd.f32 %v1829_v53, %v758_v52 }
  0xcb   : > { %v821_v1 = vmul.f32 0.35355338, %v759_v57 }
  0xcd   : > { %v874_v58 = vpop.f32.mrf.mxu1 }
  0xce   : > { %v875_v60 = vadd.f32 %v1830_v54, %v874_v58 }
  0xcf   : > { %v778_v59 = vpop.f32.mrf.mxu2 }
  0xd0   : > { %v779_v61 = vadd.f32 %v1831_v55, %v778_v59  ;;  %v854_v62 = vpop.f32.mrf.mxu0  ;;  %1731 = vmatpush.xpose.msk.msra.mxu1 %vm1009_vm2, %v875_v60 }
  0xd1   : > { %v855_v0 = vadd.f32 %v1832_v56, %v854_v62 }
  0xd2   : > { %v822_v63 = vmul.f32 0.35355338, %v779_v61 }
  0xd3   : > { %1729 = vmatpush.xpose.msk.msrb.mxu0 %vm1009_vm2, %v855_v0 }
  0xd4   : > { %1732 = vmatmul.msk.f32.vlgmr.msra.gmra.mxu1 %vm1009_vm2, %v822_v63  ;;  %v818_v2 = vpop.f32.mrf.mxu3 }
  0xd5   : > { %v819_v8 = vadd.f32 %v1833_v4, %v818_v2 }
  0xd6   : > { %1730 = vmatmul.msk.f32.vlgmr.msrb.gmra.mxu0 %vm1009_vm2, %v821_v1 }
  0xd7   : > { %v798_v3 = vpop.f32.mrf.mxu2  ;;  %v824_v14 = vmul.f32 0.35355338, %v819_v8  ;;  %v711_v8 = vld [vmem:[%s2444_s3 + $0x18] sm:$0xff] }
  0xd8   : > { %v799_v9 = vadd.f32 %v1834_v5, %v798_v3  ;;  %v708_v5 = vld [vmem:[%s2444_s3] sm:$0xff] }
  0xd9   : > { %v966_v18 = vpop.f32.mrf.mxu1 }
  0xda   : > { %v823_v16 = vmul.f32 0.35355338, %v799_v9  ;;  %v967_v20 = vadd.f32 %v1837_v17, %v966_v18 }
  0xdb   : > { %v946_v21 = vpop.f32.mrf.mxu0 }
  0xdc   : > { %1199 = vmatpush.msrb.mxu1 %v967_v20  ;;  %v947_v22 = vadd.f32 %v1838_v19, %v946_v21  ;;  %v2297_v20 = vld [vmem:[%s2169_s0] sm:$0x3f] }
  0xde   : > { %v914_v10 = vpop.f32.mrf.mxu3  ;;  %1176 = vmatpush.msra.mxu0 %v947_v22 }
  0xdf   : > { %v894_v11 = vpop.f32.mrf.mxu2  ;;  %v915_v12 = vadd.f32 %v1835_v6, %v914_v10  ;;  %v709_v6 = vld [vmem:[%s2444_s3 + $0x8] sm:$0xff] }
  0xe0   : > { %v895_v13 = vadd.f32 %v1836_v7, %v894_v11  ;;  %1268 = vmatpush.msrb.mxu0 %v708_v5  ;;  %1291 = vmatpush.msra.mxu1 %v709_v6  ;;  %v710_v7 = vld [vmem:[%s2444_s3 + $0x10] sm:$0xff] }
  0xe1   : > { %1735 = vmatpush.xpose.msk.msrb.mxu3 %vm1009_vm2, %v915_v12 }
  0xe2   : > { %1733 = vmatpush.xpose.msk.msra.mxu2 %vm1009_vm2, %v895_v13 }
  0xe4   : > { %1736 = vmatmul.msk.f32.vlgmr.msrb.gmra.mxu3 %vm1009_vm2, %v824_v14 }
  0xe5   : > { %1734 = vmatmul.msk.f32.vlgmr.msra.gmra.mxu2 %vm1009_vm2, %v823_v16 }
  0xe7   : > { %v1006_v25 = vpop.f32.mrf.mxu3 }
  0xe8   : > { %v1007_v26 = vadd.f32 %v1839_v23, %v1006_v25  ;;  %v986_v27 = vpop.f32.mrf.mxu2 }
  0xe9   : > { %v987_v28 = vadd.f32 %v1840_v24, %v986_v27  ;;  %v1349_v24 = vperm.slane %v2297_v20, 0 }
  0xea   : > { %1245 = vmatpush.msra.mxu3 %v1007_v26 }
  0xeb   : > { %1222 = vmatpush.msrb.mxu2 %v987_v28 }
  0xec   : > { %1337 = vmatpush.msrb.mxu3 %v711_v8  ;;  %v1425_v8 = vperm.slane %v2297_v20, 3 }
  0xed   : > { %1314 = vmatpush.msra.mxu2 %v710_v7 }
 0x151   : > { %v1059_v31 = vpop.f32.mrf.mxu1 }
 0x152   : > { %v1117_v32 = vsel %vm1009_vm2, %v1059_v31, -inf }
 0x153   : > { %v1033_v29 = vpop.f32.mrf.mxu0 }
 0x154   : > { %v1114_v30 = vsel %vm1009_vm2, %v1033_v29, -inf }
 0x155   : > { %1115 = vmax.xlane.f32.xlu1 %v1114_v30  ;;  %v1960_v30 = vmov 32.0  }
 0x15d   : > { %1118 = vmax.xlane.f32.xlu1 %v1117_v32 }
 0x167   : > { %v1111_v35 = vpop.f32.mrf.mxu3 }
 0x168   : > { %v1085_v33 = vpop.f32.mrf.mxu2  ;;  %v1123_v36 = vsel %vm1009_vm2, %v1111_v35, -inf }
 0x169   : > { %v1120_v34 = vsel %vm1009_vm2, %v1085_v33, -inf }
 0x16a   : > { %1121 = vmax.xlane.f32.xlu0 %v1120_v34 }
 0x172   : > { %1124 = vmax.xlane.f32.xlu0 %v1123_v36 }
 0x1c8   : > { %v1116_v37 = vpop.xlane.xlu1 %1115 }
 0x1c9   : > { %v1126_v38 = vsub.f32 %v1033_v29, %v1116_v37 }
 0x1cb   : > { %v1130_v39 = vmul.f32 1.442695, %v1126_v38 }
 0x1cd   : > { %1842 = vpow2.f32 %v1130_v39 }
 0x1d0   : > { %v1119_v40 = vpop.xlane.xlu1 %1118 }
 0x1d1   : > { %v1127_v41 = vsub.f32 %v1059_v31, %v1119_v40 }
 0x1d3   : > { %v1843_v42 = vpop.eup %1842  ;;  %v1132_v43 = vmul.f32 1.442695, %v1127_v41  ;;  %v1388_v41 = vld [vmem:[%s2153_s23 + $0x18] sm:$0xff] }
 0x1d4   : > { %v1138_v44 = vsel %vm1009_vm2, %v1843_v42, 0.0 }
 0x1d5   : > { %1844 = vpow2.f32 %v1132_v43  ;;  %1139 = vadd.xlane.f32.xlu0 %v1138_v44  ;;  %v1386_v43 = vld [vmem:[%s2153_s23 + $0x8] sm:$0xff]  ;;  %v1385_v44 = vld [vmem:[%s2153_s23] sm:$0xff] }
 0x1db   : > { %v1845_v45 = vpop.eup %1844 }
 0x1dc   : > { %v1141_v47 = vsel %vm1009_vm2, %v1845_v45, 0.0 }
 0x1dd   : > { %v1122_v46 = vpop.xlane.xlu0 %1121  ;;  %1142 = vadd.xlane.f32.xlu1 %v1141_v47  ;;  %v1422_v47 = vld [vmem:[%s2163_s25 + $0x28] sm:$0xff] }
 0x1de   : > { %v1128_v48 = vsub.f32 %v1085_v33, %v1122_v46  ;;  %v1423_v46 = vld [vmem:[%s2163_s25 + $0x30] sm:$0xff] }
 0x1e0   : > { %v1134_v49 = vmul.f32 1.442695, %v1128_v48 }
 0x1e2   : > { %1846 = vpow2.f32 %v1134_v49 }
 0x1e5   : > { %v1125_v50 = vpop.xlane.xlu0 %1124 }
 0x1e6   : > { %v1129_v51 = vsub.f32 %v1111_v35, %v1125_v50  ;;  %v1421_v50 = vld [vmem:[%s2163_s25 + $0x20] sm:$0xff] }
 0x1e8   : > { %v1847_v52 = vpop.eup %1846  ;;  %v1136_v53 = vmul.f32 1.442695, %v1129_v51 }
 0x1e9   : > { %v1144_v54 = vsel %vm1009_vm2, %v1847_v52, 0.0 }
 0x1ea   : > { %1848 = vpow2.f32 %v1136_v53  ;;  %1145 = vadd.xlane.f32.xlu2 %v1144_v54 }
 0x1f0   : > { %v1849_v55 = vpop.eup %1848 }
 0x1f1   : > { %v1147_v56 = vsel %vm1009_vm2, %v1849_v55, 0.0 }
 0x1f2   : > { %1148 = vadd.xlane.f32.xlu2 %v1147_v56 }
 0x248   : > { %v1140_v57 = vpop.xlane.xlu0 %1139 }
 0x249   : > { %1850 = vrcp.f32 %v1140_v57 }
 0x24f   : > { %v1851_v58 = vpop.eup %1850 }
 0x250   : > { %v1154_v59 = vmul.f32 %v1851_v58, %v1843_v42  ;;  %v1143_v60 = vpop.xlane.xlu1 %1142  ;;  %v1387_v42 = vld [vmem:[%s2153_s23 + $0x10] sm:$0xff]  ;;  %s1479_s23 = scalar_lea.sflag [#allocation3], %s2449_s19 }
 0x251   : > { %1852 = vrcp.f32 %v1143_v60 }
 0x252   : > { %1737 = vmatmul.msk.f32.vlgmr.msra.gmra.mxu0 %vm1009_vm2, %v1154_v59  ;;  %v1381_v59 = vperm.slane %v2297_v20, 1 }
 0x253   : > { %1408 = vmatpush.msra.mxu0 %v1388_v41 }
 0x255   : > { %1409 = vmatpush.msra.mxu0 %v1387_v42 }
 0x257   : > { %v1853_v61 = vpop.eup %1852  ;;  %1410 = vmatpush.msra.mxu0 %v1386_v43 }
 0x258   : > { %v1155_v62 = vmul.f32 %v1853_v61, %v1845_v45  ;;  %v1424_v45 = vld [vmem:[%s2163_s25 + $0x38] sm:$0xff] }
 0x259   : > { %1411 = vmatpush.msra.mxu0 %v1385_v44 }
 0x25a   : > { %1738 = vmatmul.msk.f32.vlgmr.msrb.gmra.mxu1 %vm1009_vm2, %v1155_v62  ;;  %v1383_v62 = vperm.slane %v2297_v20, 2 }
 0x25b   : > { %1438 = vmatpush.msrb.mxu1 %v1424_v45 }
 0x25d   : > { %v1146_v63 = vpop.xlane.xlu2 %1145  ;;  %1439 = vmatpush.msrb.mxu1 %v1423_v46 }
 0x25e   : > { %1854 = vrcp.f32 %v1146_v63 }
 0x25f   : > { %1440 = vmatpush.msrb.mxu1 %v1422_v47 }
 0x261   : > { %1441 = vmatpush.msrb.mxu1 %v1421_v50 }
 0x264   : > { %v1855_v0 = vpop.eup %1854 }
 0x265   : > { %v1156_v1 = vmul.f32 %v1855_v0, %v1847_v52  ;;  %v1149_v2 = vpop.xlane.xlu2 %1148  ;;  %v1420_v52 = vld [vmem:[%s2163_s25 + $0x18] sm:$0xff] }
 0x266   : > { %1856 = vrcp.f32 %v1149_v2  ;;  %1442 = vmatpush.msrb.mxu1 %v1420_v52  ;;  %v1418_v2 = vld [vmem:[%s2163_s25 + $0x8] sm:$0xff] }
 0x267   : > { %1739 = vmatmul.msk.f32.vlgmr.msrb.gmra.mxu2 %vm1009_vm2, %v1156_v1  ;;  %1858 = vrcp.f32 %v1960_v30  ;;  %v1419_v1 = vld [vmem:[%s2163_s25 + $0x10] sm:$0xff] }
 0x268   : > { %1443 = vmatpush.msrb.mxu1 %v1419_v1 }
 0x26a   : > { %1444 = vmatpush.msrb.mxu1 %v1418_v2 }
 0x26c   : > { %v1857_v3 = vpop.eup %1856 }
 0x26d   : > { %v1157_v4 = vmul.f32 %v1857_v3, %v1849_v55  ;;  %v1859_v31 = vpop.eup %1858  ;;  %v1417_v3 = vld [vmem:[%s2163_s25] sm:$0xff] }
 0x26e   : > { %v1356_v32 = vmul.f32 32.0, %v1859_v31  ;;  %vm1360_vm3 = vweird.f32 %v1859_v31  ;;  %1445 = vmatpush.msrb.mxu1 %v1417_v3 }
 0x26f   : > { %1740 = vmatmul.msk.f32.vlgmr.msra.gmra.mxu3 %vm1009_vm2, %v1157_v4  ;;  %v1841_v4 = vld [vmem:[%s640_s27] ss:$0 sm:$0xff]  ;;  %s1878_s27 = sshra.s32 %s1494_s24, 4  ;;  %s1879_s27 = int_to_ptr.hbm [resolvable:$true] %s1878_s27 }
 0x270   : > { %v1357_v33 = vsub.f32 1.0, %v1356_v32  ;;  %v1475_v32 = vperm.slane %v2297_v20, 5  ;;  %s1880_s21 = scalar_lea.hbm %s1879_s27, 8  ;;  %p1885_p5 = scmp.lt.s32.totalorder %s1879_s27, %s2447_s16 }
 0x271   : > { %p1881_p1 = scmp.ne.s32.totalorder %s1879_s27, %s1880_s21  ;;  %p1886_p6 = scmp.lt.s32.totalorder %s1884_s13, %s1880_s21 }
 0x272   : > { %v1358_v34 = vmul.f32 %v1859_v31, %v1357_v33 }
 0x273   : > { %p1882_p2 = pnand %p1881_p1, %p2080_p3  ;;  %p1887_p7 = por %p1886_p6, %p1885_p5 }
 0x274   : > { %v1359_v35 = vadd.f32 %v1859_v31, %v1358_v34 }
 0x275   : > { %p1883_p4 = pneg %p1882_p2 }
 0x276   : > { %v2303_v36 = vsel %vm1360_vm3, %v1859_v31, %v1359_v35 }
 0x277   : > { %p1888_p8 = pnand %p1887_p7, %p1883_p4 }
 0x2cf   : > { %v1178_v9 = vpop.f32.mrf.mxu0 }
 0x2d0   : > { %1741 = vmatmul.msk.f32.vlgmr.msrb.gmra.mxu0 %vm1009_vm2, %v1178_v9 }
 0x2d7   : > { %v1201_v10 = vpop.f32.mrf.mxu1 }
 0x2d8   : > { %1742 = vmatmul.msk.f32.vlgmr.msra.gmra.mxu1 %vm1009_vm2, %v1201_v10 }
 0x2ea   : > { %v1224_v11 = vpop.f32.mrf.mxu2 }
 0x2eb   : > { %1743 = vmatmul.msk.f32.vlgmr.msra.gmra.mxu2 %vm1009_vm2, %v1224_v11 }
 0x2f2   : > { %v1247_v12 = vpop.f32.mrf.mxu3 }
 0x2f3   : > { %1744 = vmatmul.msk.f32.vlgmr.msrb.gmra.mxu3 %vm1009_vm2, %v1247_v12 }
 0x34d   : > { %v1270_v14 = vpop.f32.mrf.mxu0 }
 0x34e   : > { %v1342_v18 = vsel %vm737_vm1, %v1270_v14, 0.0 }
 0x355   : > { %v1293_v13 = vpop.f32.mrf.mxu1 }
 0x356   : > { %v1343_v17 = vsel %vm737_vm1, %v1293_v13, 0.0 }
 0x357   : > { %v1344_v21 = vadd.f32 %v1343_v17, %v1342_v18 }
 0x36e   : > { %v1316_v16 = vpop.f32.mrf.mxu2 }
 0x36f   : > { %v1345_v19 = vsel %vm737_vm1, %v1316_v16, 0.0 }
 0x370   : > { %v1346_v22 = vadd.f32 %v1345_v19, %v1344_v21 }
 0x376   : > { %v1339_v23 = vpop.f32.mrf.mxu3 }
 0x377   : > { %v1347_v25 = vsel %vm737_vm1, %v1339_v23, 0.0 }
 0x378   : > { %v1348_v26 = vadd.f32 %v1347_v25, %v1346_v22 }
 0x37a   : > { %v1350_v27 = vadd.f32 %v1349_v24, %v1348_v26 }
 0x37c   : > { %v1351_v28 = vadd.f32 %v1350_v27, %v2191_v15 }
 0x37e   : > { %v1352_v29 = vsel %vm737_vm1, %v1351_v28, 0.0 }
 0x37f   : > { %1353 = vadd.xlane.f32.xlu2 %v1352_v29  ;;  %v1473_v29 = vperm.slane %v2297_v20, 4 }
 0x3f2   : > { %v1354_v15 = vpop.xlane.xlu2 %1353 }
 0x3f3   : > { %v1362_v37 = vmul.f32 %v2303_v36, %v1354_v15 }
 0x3f5   : > { %v1363_v38 = vsub.f32 %v1351_v28, %v1362_v37 }
 0x3f7   : > { %v1364_v39 = vmul.f32 %v1363_v38, %v1363_v38 }
 0x3f9   : > { %v1365_v40 = vsel %vm737_vm1, %v1364_v39, 0.0 }
 0x3fa   : > { %1366 = vadd.xlane.f32.xlu0 %v1365_v40 }
 0x46d   : > { %v1367_v48 = vpop.xlane.xlu0 %1366 }
 0x46e   : > { %v1368_v49 = vmul.f32 %v1367_v48, %v2303_v36 }
 0x470   : > { %v1369_v51 = vadd.f32 1e-05, %v1368_v49 }
 0x472   : > { %1860 = vrsqrt.f32 %v1369_v51  ;;  %vm1376_vm5 = vweird.f32 %v1369_v51 }
 0x478   : > { %v1861_v53 = vpop.eup %1860 }
 0x479   : > { %v1371_v54 = vmul.f32 %v1861_v53, %v1369_v51  ;;  %vm1377_vm4 = vweird.f32 %v1861_v53 }
 0x47a   : > { %vm1378_vm6 = vmor %vm1376_vm5, %vm1377_vm4 }
 0x47b   : > { %v1372_v55 = vmul.f32 %v1861_v53, %v1371_v54 }
 0x47d   : > { %v1373_v56 = vmul.f32 0.5, %v1372_v55 }
 0x47f   : > { %v1374_v57 = vsub.f32 1.5, %v1373_v56 }
 0x481   : > { %v1375_v58 = vmul.f32 %v1861_v53, %v1374_v57 }
 0x483   : > { %v1379_v60 = vsel %vm1378_vm6, %v1861_v53, %v1375_v58 }
 0x484   : > { %v1380_v61 = vmul.f32 %v1379_v60, %v1363_v38 }
 0x486   : > { %v1382_v63 = vmul.f32 %v1381_v59, %v1380_v61 }
 0x488   : > { %v1384_v0 = vadd.f32 %v1383_v62, %v1382_v63 }
 0x48a   : > { %1745 = vmatmul.msk.f32.vlgmr.msra.gmra.mxu0 %vm737_vm1, %v1384_v0 }
 0x507   : > { %v1413_v5 = vpop.f32.mrf.mxu0 }
 0x508   : > { %v1414_v6 = vadd.f32 %v1841_v4, %v1413_v5 }
 0x50a   : > { %v1416_v7 = vmax.f32 %v1414_v6, 0.0 }
 0x50c   : > { %1746 = vmatmul.msk.f32.vlgmr.msrb.gmra.mxu1 %vm1426_vm7, %v1416_v7 }
 0x589   : > { %v1447_v9 = vpop.f32.mrf.mxu1 }
 0x58a   : > { %v1448_v10 = vadd.f32 %v1447_v9, %v1425_v8 }
 0x58c   : > { %v1450_v11 = vadd.f32 %v1448_v10, %v1384_v0 }
 0x58e   : > { %v1451_v12 = vsel %vm737_vm1, %v1450_v11, 0.0 }
 0x58f   : > { %1452 = vadd.xlane.f32.xlu1 %v1451_v12 }
 0x602   : > { %v1453_v13 = vpop.xlane.xlu1 %1452 }
 0x603   : > { %v1454_v14 = vmul.f32 %v1453_v13, %v2303_v36 }
 0x605   : > { %v1455_v16 = vsub.f32 %v1450_v11, %v1454_v14 }
 0x607   : > { %v1456_v17 = vmul.f32 %v1455_v16, %v1455_v16 }
 0x609   : > { %v1457_v18 = vsel %vm737_vm1, %v1456_v17, 0.0 }
 0x60a   : > { %1458 = vadd.xlane.f32.xlu2 %v1457_v18 }
 0x67d   : > { %v1459_v19 = vpop.xlane.xlu2 %1458 }
 0x67e   : > { %v1460_v21 = vmul.f32 %v1459_v19, %v2303_v36 }
 0x680   : > { %v1461_v22 = vadd.f32 1e-05, %v1460_v21 }
 0x682   : > { %1862 = vrsqrt.f32 %v1461_v22  ;;  %vm1468_vm9 = vweird.f32 %v1461_v22 }
 0x688   : > { %v1863_v23 = vpop.eup %1862 }
 0x689   : > { %v1463_v24 = vmul.f32 %v1863_v23, %v1461_v22  ;;  %vm1469_vm8 = vweird.f32 %v1863_v23 }
 0x68a   : > { %vm1470_vm10 = vmor %vm1468_vm9, %vm1469_vm8 }
 0x68b   : > { %v1464_v25 = vmul.f32 %v1863_v23, %v1463_v24 }
 0x68d   : > { %v1465_v26 = vmul.f32 0.5, %v1464_v25 }
 0x68f   : > { %v1466_v27 = vsub.f32 1.5, %v1465_v26 }
 0x691   : > { %v1467_v28 = vmul.f32 %v1863_v23, %v1466_v27 }
 0x693   : > { %v1471_v30 = vsel %vm1470_vm10, %v1863_v23, %v1467_v28 }
 0x694   : > { %v1472_v31 = vmul.f32 %v1471_v30, %v1455_v16 }
 0x696   : > { %v1474_v33 = vmul.f32 %v1473_v29, %v1472_v31 }
 0x698   : > { %v1476_v34 = vadd.f32 %v1475_v32, %v1474_v33 }
 0x69a   : > { %1477 = vst.msk [vmem:[%s2171_s26] sm:$0xff] %vm737_vm1, %v1476_v34 }
 0x69b   : > { %1891 = shalt.err (!%p1888_p8)
}
 0x69c   : > { %1757 = dma.vmem_to_hbm [thread:$0]  (%p2080_p3), %s1492_s22, 128, %s1494_s24, %s1479_s23  }
 0x69d PF: > { %s2450_s26 = sld [smem:[#allocation11_spill]] }
 0x69e   : > { %s2451_s5 = sld [smem:[#allocation5_spill]] }
 0x6a3   : > { %p1763_p10 = scmp.ge.s32.totalorder %s2450_s26, 2 }
 0x6a4   : > { %s1505_s3 = sand.u32 1, %s2451_s5  }
 0x6a5   : > { %p1760_p11 = pnand %p1763_p10, %p2090_p9  ;;  %s1506_s6 = scalar_lea.sflag [#allocation3], %s1505_s3 }
 0x6a7   : > { %p1761_p12 = pneg %p1760_p11 }
 0x6a9   : > { %1925 = dma.done.wait (%p1761_p12), %s1506_s6, 128  }
 0x6aa   : > { %1927 = vsyncadd (%p1761_p12), %s1506_s6, 4294967168  ;;  %s26_s15 = sadd.s32 1, %s2450_s26   ;;  %s2453_s25 = sld [smem:[#allocation6_spill]] }
 0x6ab   : > { %p23_p13 = scmp.ge.s32.totalorder %s26_s15, 6   ;;  %s2454_s26 = sld [smem:[#allocation7_spill]] }
 0x6ac   : > { %s2455_s27 = sld [smem:[#allocation16_spill]] }
 0x6ad   : > { %s2456_s28 = sld [smem:[#allocation9_spill]]  ;;  %25 = sbr.rel (!%p23_p13) target bundleno = 14 (0xe), region = 144 }
 0x6ae   : > { %s2457_s29 = sld [smem:[#allocation10_spill]] }
 0x6af   : > { %s2458_s30 = sld [smem:[#allocation12_spill]] }
 0x6b0   : > { %s2459_s14 = sld [smem:[#allocation14_spill]] }
 0x6b2   :  { %1512 = vsyncpa [#allocation3], 1 }
 0x6b3   :  { %1514 = vsyncpa [#allocation3 + $0x1], 1 }

</bundles_post_ra>
